<compile_context>
chip_gen: v5e
topology: v5e:2x2
jax: 0.10.0
libtpu: 0.0.40
codegen_flags: <defaults>
</compile_context>

<pallas_src>
import math
from functools import partial

import jax
import jax.numpy as jnp
from jax import lax
from jax.experimental import pallas as pl
from jax.experimental.pallas import tpu as pltpu


# ---------------------------------------------------------------------------
# Generation-aware VMEM budgeting (128 MiB on v5e/v6e, 64 MiB per TC on v7x).
# ---------------------------------------------------------------------------
def _tpu_vmem_capacity_bytes() -> int:
    try:
        return int(pltpu.get_tpu_info().vmem_capacity_bytes)
    except Exception:
        return 64 * 2**20            # conservative fallback (v7x-sized VMEM)


def _vmem_budget_bytes() -> int:
    """Scoped-VMEM budget with headroom for compiler-internal scratch.

    128 MiB (v5e/v6e) -> ~102 MiB ; 64 MiB (v7x) -> 48 MiB.
    """
    cap = _tpu_vmem_capacity_bytes()
    return max(32 * 2**20, min(int(0.80 * cap), cap - 16 * 2**20))


# ---------------------------------------------------------------------------
# Pass 1: fused Q/K/V projections with resident weight slabs.
# ---------------------------------------------------------------------------
def _qkv_proj_kernel(xq_ref, xk_ref, xv_ref,
                     wq_ref, wk_ref, wv_ref,
                     bq_ref, bk_ref, bv_ref,
                     q_out, k_out, v_out,
                     *, inv_scale, heads_per_group, head_dim, compute_dtype):
    """Grid step = (head-group hg, batch b, seq tile si).

    x*_ref : (TS, E)      input activations
    w*_ref : (E, G*Dh)    resident weight column slab for this head group
    b*_ref : (1, G*Dh)    matching bias slab (f32)
    *_out  : (G, TS, Dh)  head-major projected outputs (compute dtype)
    """
    xq = xq_ref[...].astype(compute_dtype)
    xk = xk_ref[...].astype(compute_dtype)
    xv = xv_ref[...].astype(compute_dtype)

    q = jnp.dot(xq, wq_ref[...], preferred_element_type=jnp.float32) + bq_ref[...]
    k = jnp.dot(xk, wk_ref[...], preferred_element_type=jnp.float32) + bk_ref[...]
    v = jnp.dot(xv, wv_ref[...], preferred_element_type=jnp.float32) + bv_ref[...]
    q = q * inv_scale                     # fold 1/sqrt(Dh) into Q once

    # Split the wide (TS, G*Dh) result into per-head (TS, Dh) tiles.
    # NOTE: for Dh < 128 these stores are not fully lane-dense; the resident
    # wide matmul above is the dominant win, so this is accepted.
    for g in range(heads_per_group):
        lo = g * head_dim
        q_out[g] = q[:, lo:lo + head_dim].astype(q_out.dtype)
        k_out[g] = k[:, lo:lo + head_dim].astype(k_out.dtype)
        v_out[g] = v[:, lo:lo + head_dim].astype(v_out.dtype)


# ---------------------------------------------------------------------------
# Pass 2: flash attention over KV tiles + fused output projection.
# ---------------------------------------------------------------------------
def _flash_attn_kernel(q_ref, k_ref, v_ref, wo_ref, bo_ref, o_ref,
                       m_scr, l_scr, acc_scr, o_scr,
                       *, wo_is_full, compute_dtype):
    """Grid = (b, qi, h, kv); (h, kv) are the reduction ('arbitrary') axes.

    q_ref  : (TQ, Dh)        pre-scaled queries of head h
    k_ref  : (TKV, Dh)
    v_ref  : (TKV, Dh)
    wo_ref : (H, Dh, E) resident full W_o  -or-  (Dh, E) streamed head slab
    bo_ref : (1, E)          output-projection bias (f32)
    o_ref  : (TQ, E)         final output tile (resident across h and kv)
    """
    h, kv = pl.program_id(2), pl.program_id(3)
    nh, nkv = pl.num_programs(2), pl.num_programs(3)

    @pl.when((h == 0) & (kv == 0))
    def _():
        o_scr[...] = jnp.zeros_like(o_scr)

    @pl.when(kv == 0)
    def _():
        m_scr[...] = jnp.full_like(m_scr, -jnp.inf)
        l_scr[...] = jnp.zeros_like(l_scr)
        acc_scr[...] = jnp.zeros_like(acc_scr)

    # scores = q @ k^T via dot_general contracting last dims (no explicit .T).
    s = lax.dot_general(q_ref[...], k_ref[...],
                        (((1,), (1,)), ((), ())),
                        preferred_element_type=jnp.float32)          # (TQ, TKV)

    # Online softmax update (all f32).
    m_prev = m_scr[...]
    m_new = jnp.maximum(m_prev, jnp.max(s, axis=-1, keepdims=True))
    alpha = jnp.exp(m_prev - m_new)
    p = jnp.exp(s - m_new)
    l_scr[...] = alpha * l_scr[...] + jnp.sum(p, axis=-1, keepdims=True)
    acc_scr[...] = alpha * acc_scr[...] + jnp.dot(
        p.astype(compute_dtype), v_ref[...], preferred_element_type=jnp.float32)
    m_scr[...] = m_new

    # Finalize this head: normalize (EUP approx reciprocal) and fuse the
    # per-head output-projection slab into the resident (TQ, E) accumulator.
    @pl.when(kv == nkv - 1)
    def _():
        inv_l = pl.reciprocal(l_scr[...], approx=True)
        attn_h = (acc_scr[...] * inv_l).astype(compute_dtype)        # (TQ, Dh)
        wo_h = wo_ref[h] if wo_is_full else wo_ref[...]              # (Dh, E)
        o_scr[...] += jnp.dot(attn_h, wo_h, preferred_element_type=jnp.float32)

    @pl.when((h == nh - 1) & (kv == nkv - 1))
    def _():
        o_ref[...] = (o_scr[...] + bo_ref[...]).astype(o_ref.dtype)


# ---------------------------------------------------------------------------
# Wrapper.
# ---------------------------------------------------------------------------
def multi_head_attention(query, key, value, params, *, num_heads,
                         ts=None, tq=None, tkv=None,
                         compute_dtype=jnp.bfloat16, out_dtype=None):
    """query/key/value: (B, S, E).  params: dict of (in,out) weights / (1,E) biases."""
    B, S, E = query.shape
    H = num_heads
    assert E % H == 0, "embed_dim must be divisible by num_heads"
    Dh = E // H
    inv_scale = 1.0 / math.sqrt(Dh)
    out_dtype = query.dtype if out_dtype is None else out_dtype

    cbytes = jnp.dtype(compute_dtype).itemsize
    xbytes = jnp.dtype(query.dtype).itemsize
    obytes = jnp.dtype(out_dtype).itemsize

    budget = _vmem_budget_bytes()

    # Tile defaults: bigger seq tiles where 128 MiB VMEM allows (v5e/v6e),
    # moderate tiles on v7x (64 MiB).  tkv=256 fills the 256-wide MXU on
    # v6e/v7x and halves per-step overhead everywhere.
    if ts is None:
        ts = 512 if budget >= 96 * 2**20 else 256
    if tq is None:
        tq = 256
    if tkv is None:
        tkv = 256
    ts, tq, tkv = min(ts, S), min(tq, S), min(tkv, S)
    assert S % ts == 0 and S % tq == 0 and S % tkv == 0, (
        "sequence length must be divisible by the tile sizes")

    # ---- Pass 1: choose the widest head group whose working set fits ------
    def _p1_working_set(g):
        return 2 * (3 * ts * E * xbytes          # activation tiles
                    + 3 * E * g * Dh * cbytes    # resident weight slabs
                    + 3 * g * Dh * 4             # bias slabs
                    + 3 * g * ts * Dh * cbytes)  # projected output tiles

    heads_per_group = 1
    for g in sorted((d for d in range(1, H + 1) if H % d == 0), reverse=True):
        if _p1_working_set(g) <= budget:
            heads_per_group = g
            break
    n_groups = H // heads_per_group
    gdh = heads_per_group * Dh

    def _group_w(w):          # (E, E) -> (n_groups, E, gdh): columns per group
        if n_groups == 1:
            wg = w.reshape(1, E, E)
        else:
            wg = jnp.transpose(w.reshape(E, n_groups, gdh), (1, 0, 2))
        return wg.astype(compute_dtype)

    def _group_b(b):          # (1, E) -> (n_groups, 1, gdh)
        return b.reshape(n_groups, 1, gdh).astype(jnp.float32)

    wq_g, wk_g, wv_g = (_group_w(params[n]) for n in ("wq", "wk", "wv"))
    bq_g, bk_g, bv_g = (_group_b(params[n]) for n in ("bq", "bk", "bv"))

    x_spec = pl.BlockSpec((None, ts, E), lambda hg, b, si: (b, si, 0))
    w_spec = pl.BlockSpec((None, E, gdh), lambda hg, b, si: (hg, 0, 0))
    b_spec = pl.BlockSpec((None, 1, gdh), lambda hg, b, si: (hg, 0, 0))
    qkv_spec = pl.BlockSpec((None, heads_per_group, ts, Dh),
                            lambda hg, b, si: (b, hg, si, 0))

    qkv_shape = jax.ShapeDtypeStruct((B, H, S, Dh), compute_dtype)

    q_hd, k_hd, v_hd = pl.pallas_call(
        partial(_qkv_proj_kernel, inv_scale=inv_scale,
                heads_per_group=heads_per_group, head_dim=Dh,
                compute_dtype=compute_dtype),
        out_shape=(qkv_shape, qkv_shape, qkv_shape),
        grid_spec=pltpu.PrefetchScalarGridSpec(
            num_scalar_prefetch=0,
            grid=(n_groups, B, S // ts),
            in_specs=[x_spec, x_spec, x_spec,
                      w_spec, w_spec, w_spec,
                      b_spec, b_spec, b_spec],
            out_specs=(qkv_spec, qkv_spec, qkv_spec),
        ),
        compiler_params=pltpu.CompilerParams(
            dimension_semantics=("parallel", "parallel", "parallel"),
            vmem_limit_bytes=budget),
    )(query, key, value, wq_g, wk_g, wv_g, bq_g, bk_g, bv_g)

    # ---- Pass 2: flash attention + fused output projection -----------------
    wo_hde = params["wo"].reshape(H, Dh, E).astype(compute_dtype)  # rows per head
    bo = params["bo"].reshape(1, E).astype(jnp.float32)

    p2_ws = (2 * (tq * Dh + 2 * tkv * Dh) * cbytes    # q/k/v tiles (dbl-buffered)
             + 2 * E * 4                              # bias
             + 2 * tq * E * obytes                    # output tile
             + (2 * tq + tq * Dh + tq * E) * 4)       # f32 scratch
    wo_resident = (p2_ws + 2 * H * Dh * E * cbytes) <= budget

    q_spec = pl.BlockSpec((None, None, tq, Dh), lambda b, qi, h, kv: (b, h, qi, 0))
    kv_spec = pl.BlockSpec((None, None, tkv, Dh), lambda b, qi, h, kv: (b, h, kv, 0))
    bo_spec = pl.BlockSpec((1, E), lambda b, qi, h, kv: (0, 0))
    out_spec = pl.BlockSpec((None, tq, E), lambda b, qi, h, kv: (b, qi, 0))
    if wo_resident:
        # Full W_o resident in VMEM (constant index -> fetched once),
        # indexed per head in-kernel.
        wo_spec = pl.BlockSpec((H, Dh, E), lambda b, qi, h, kv: (0, 0, 0))
    else:
        # Too large for the budget (e.g. E >= 4k on v7x): stream per-head slab.
        wo_spec = pl.BlockSpec((None, Dh, E), lambda b, qi, h, kv: (h, 0, 0))

    out = pl.pallas_call(
        partial(_flash_attn_kernel, wo_is_full=wo_resident,
                compute_dtype=compute_dtype),
        out_shape=jax.ShapeDtypeStruct((B, S, E), out_dtype),
        grid_spec=pltpu.PrefetchScalarGridSpec(
            num_scalar_prefetch=0,
            grid=(B, S // tq, H, S // tkv),
            in_specs=[q_spec, kv_spec, kv_spec, wo_spec, bo_spec],
            out_specs=out_spec,
            scratch_shapes=[
                pltpu.VMEM((tq, 1), jnp.float32),    # running max m
                pltpu.VMEM((tq, 1), jnp.float32),    # running denom l
                pltpu.VMEM((tq, Dh), jnp.float32),   # per-head PV accumulator
                pltpu.VMEM((tq, E), jnp.float32),    # fused out-proj accumulator
            ],
        ),
        compiler_params=pltpu.CompilerParams(
            dimension_semantics=("parallel", "parallel", "arbitrary", "arbitrary"),
            vmem_limit_bytes=budget),
    )(q_hd, k_hd, v_hd, wo_hde, bo)

    return out


# ---------------------------------------------------------------------------
# Pure-JAX reference mirroring the PyTorch forward (eval mode, no mask).
# ---------------------------------------------------------------------------
def _reference(query, key, value, params, *, num_heads):
    B, S, E = query.shape
    Dh = E // num_heads
    scale = math.sqrt(Dh)

    def lin(x, w, b):
        return x @ w + b                       # w is (in, out), b is (1, out)

    q = lin(query, params["wq"], params["bq"]).reshape(B, S, num_heads, Dh).transpose(0, 2, 1, 3)
    k = lin(key, params["wk"], params["bk"]).reshape(B, S, num_heads, Dh).transpose(0, 2, 1, 3)
    v = lin(value, params["wv"], params["bv"]).reshape(B, S, num_heads, Dh).transpose(0, 2, 1, 3)

    scores = jnp.einsum("bhqd,bhkd->bhqk", q, k) / scale
    attn = jax.nn.softmax(scores, axis=-1)
    out = jnp.einsum("bhqk,bhkd->bhqd", attn, v)
    out = out.transpose(0, 2, 1, 3).reshape(B, S, E)
    return lin(out, params["wo"], params["bo"])


def _make_params(key, E):
    ks = jax.random.split(key, 8)
    def w(k): return 0.05 * jax.random.normal(k, (E, E), jnp.float32)
    def b(k): return 0.05 * jax.random.normal(k, (1, E), jnp.float32)
    return {"wq": w(ks[0]), "bq": b(ks[1]), "wk": w(ks[2]), "bk": b(ks[3]),
            "wv": w(ks[4]), "bv": b(ks[5]), "wo": w(ks[6]), "bo": b(ks[7])}


def _run_case(key, *, B, S, E, H, **kw):
    kp, kq, kk, kv = jax.random.split(key, 4)
    params = _make_params(kp, E)
    q = jax.random.normal(kq, (B, S, E), jnp.float32)
    k = jax.random.normal(kk, (B, S, E), jnp.float32)
    v = jax.random.normal(kv, (B, S, E), jnp.float32)

    out = jax.block_until_ready(
        multi_head_attention(q, k, v, params, num_heads=H, **kw))
    ref = _reference(q, k, v, params, num_heads=H)

    assert out.shape == (B, S, E)
    max_err = float(jnp.max(jnp.abs(out - ref)))
    # bf16 MXU operands with f32 accumulation -> ~1e-3-level absolute error.
    assert jnp.allclose(out, ref, atol=2e-2, rtol=2e-2), f"max abs diff {max_err}"


if __name__ == "__main__":
    base_key = jax.random.PRNGKey(0)
    key_a, key_b = jax.random.split(base_key)

    # Small shapes consistent with the module (single-tile path).
    _run_case(key_a, B=2, S=8, E=32, H=4)

    # Larger case that exercises the tiled / multi-KV-step flash path and the
    # resident-weight pipelining (grids: pass1 (1,2,2), pass2 (2,4,4,4)).
    _run_case(key_b, B=2, S=256, E=128, H=4, ts=128, tq=64, tkv=64)

    print("KERNEL_OK")
</pallas_src>

<mosaic_0001>
module attributes {stable_mosaic.version = 11 : i64} {
  func.func @_qkv_proj_kernel(%arg0: i32, %arg1: i32, %arg2: i32, %arg3: memref<1x8x32xf32, #tpu.memory_space<vmem>>, %arg4: memref<1x8x32xf32, #tpu.memory_space<vmem>>, %arg5: memref<1x8x32xf32, #tpu.memory_space<vmem>>, %arg6: memref<1x32x32xbf16, #tpu.memory_space<vmem>>, %arg7: memref<1x32x32xbf16, #tpu.memory_space<vmem>>, %arg8: memref<1x32x32xbf16, #tpu.memory_space<vmem>>, %arg9: memref<1x1x32xf32, #tpu.memory_space<vmem>>, %arg10: memref<1x1x32xf32, #tpu.memory_space<vmem>>, %arg11: memref<1x1x32xf32, #tpu.memory_space<vmem>>, %arg12: memref<1x4x8x8xbf16, #tpu.memory_space<vmem>>, %arg13: memref<1x4x8x8xbf16, #tpu.memory_space<vmem>>, %arg14: memref<1x4x8x8xbf16, #tpu.memory_space<vmem>>) attributes {dimension_semantics = [#tpu.dimension_semantics<parallel>, #tpu.dimension_semantics<parallel>, #tpu.dimension_semantics<parallel>], iteration_bounds = array<i64: 1, 2, 1>, scalar_prefetch = 0 : i64, scratch_operands = 0 : i64, tpu.core_type = #tpu.core_type<tc>, window_params = [{transform_indices = @transform_0, window_bounds = array<i64: 1, 8, 32>}, {transform_indices = @transform_1, window_bounds = array<i64: 1, 8, 32>}, {transform_indices = @transform_2, window_bounds = array<i64: 1, 8, 32>}, {transform_indices = @transform_3, window_bounds = array<i64: 1, 32, 32>}, {transform_indices = @transform_4, window_bounds = array<i64: 1, 32, 32>}, {transform_indices = @transform_5, window_bounds = array<i64: 1, 32, 32>}, {transform_indices = @transform_6, window_bounds = array<i64: 1, 1, 32>}, {transform_indices = @transform_7, window_bounds = array<i64: 1, 1, 32>}, {transform_indices = @transform_8, window_bounds = array<i64: 1, 1, 32>}, {transform_indices = @transform_9, window_bounds = array<i64: 1, 4, 8, 8>}, {transform_indices = @transform_10, window_bounds = array<i64: 1, 4, 8, 8>}, {transform_indices = @transform_11, window_bounds = array<i64: 1, 4, 8, 8>}]} {
    %c0 = arith.constant 0 : index
    %c0_0 = arith.constant 0 : index
    %c0_1 = arith.constant 0 : index
    %0 = vector.load %arg3[%c0, %c0_0, %c0_1] : memref<1x8x32xf32, #tpu.memory_space<vmem>>, vector<1x8x32xf32>
    %1 = vector.shape_cast %0 : vector<1x8x32xf32> to vector<8x32xf32>
    %2 = arith.truncf %1 : vector<8x32xf32> to vector<8x32xbf16>
    %c0_2 = arith.constant 0 : index
    %c0_3 = arith.constant 0 : index
    %c0_4 = arith.constant 0 : index
    %3 = vector.load %arg4[%c0_2, %c0_3, %c0_4] : memref<1x8x32xf32, #tpu.memory_space<vmem>>, vector<1x8x32xf32>
    %4 = vector.shape_cast %3 : vector<1x8x32xf32> to vector<8x32xf32>
    %5 = arith.truncf %4 : vector<8x32xf32> to vector<8x32xbf16>
    %c0_5 = arith.constant 0 : index
    %c0_6 = arith.constant 0 : index
    %c0_7 = arith.constant 0 : index
    %6 = vector.load %arg5[%c0_5, %c0_6, %c0_7] : memref<1x8x32xf32, #tpu.memory_space<vmem>>, vector<1x8x32xf32>
    %7 = vector.shape_cast %6 : vector<1x8x32xf32> to vector<8x32xf32>
    %8 = arith.truncf %7 : vector<8x32xf32> to vector<8x32xbf16>
    %c0_8 = arith.constant 0 : index
    %c0_9 = arith.constant 0 : index
    %c0_10 = arith.constant 0 : index
    %9 = vector.load %arg6[%c0_8, %c0_9, %c0_10] : memref<1x32x32xbf16, #tpu.memory_space<vmem>>, vector<1x32x32xbf16>
    %10 = vector.shape_cast %9 : vector<1x32x32xbf16> to vector<32x32xbf16>
    %cst = arith.constant dense<0.000000e+00> : vector<8x32xf32>
    %11 = tpu.matmul %2, %10, %cst {dimension_numbers = #tpu.dot_dimension_numbers<[1], [0], [0], [1], [0, 0, 1, 1], [], []>} : vector<8x32xbf16>, vector<32x32xbf16>, vector<8x32xf32> -> vector<8x32xf32>
    %c0_11 = arith.constant 0 : index
    %c0_12 = arith.constant 0 : index
    %c0_13 = arith.constant 0 : index
    %12 = vector.load %arg9[%c0_11, %c0_12, %c0_13] : memref<1x1x32xf32, #tpu.memory_space<vmem>>, vector<1x1x32xf32>
    %13 = vector.shape_cast %12 : vector<1x1x32xf32> to vector<1x32xf32>
    %14 = vector.broadcast %13 : vector<1x32xf32> to vector<8x32xf32>
    %15 = arith.addf %11, %14 : vector<8x32xf32>
    %c0_14 = arith.constant 0 : index
    %c0_15 = arith.constant 0 : index
    %c0_16 = arith.constant 0 : index
    %16 = vector.load %arg7[%c0_14, %c0_15, %c0_16] : memref<1x32x32xbf16, #tpu.memory_space<vmem>>, vector<1x32x32xbf16>
    %17 = vector.shape_cast %16 : vector<1x32x32xbf16> to vector<32x32xbf16>
    %cst_17 = arith.constant dense<0.000000e+00> : vector<8x32xf32>
    %18 = tpu.matmul %5, %17, %cst_17 {dimension_numbers = #tpu.dot_dimension_numbers<[1], [0], [0], [1], [0, 0, 1, 1], [], []>} : vector<8x32xbf16>, vector<32x32xbf16>, vector<8x32xf32> -> vector<8x32xf32>
    %c0_18 = arith.constant 0 : index
    %c0_19 = arith.constant 0 : index
    %c0_20 = arith.constant 0 : index
    %19 = vector.load %arg10[%c0_18, %c0_19, %c0_20] : memref<1x1x32xf32, #tpu.memory_space<vmem>>, vector<1x1x32xf32>
    %20 = vector.shape_cast %19 : vector<1x1x32xf32> to vector<1x32xf32>
    %21 = vector.broadcast %20 : vector<1x32xf32> to vector<8x32xf32>
    %22 = arith.addf %18, %21 : vector<8x32xf32>
    %c0_21 = arith.constant 0 : index
    %c0_22 = arith.constant 0 : index
    %c0_23 = arith.constant 0 : index
    %23 = vector.load %arg8[%c0_21, %c0_22, %c0_23] : memref<1x32x32xbf16, #tpu.memory_space<vmem>>, vector<1x32x32xbf16>
    %24 = vector.shape_cast %23 : vector<1x32x32xbf16> to vector<32x32xbf16>
    %cst_24 = arith.constant dense<0.000000e+00> : vector<8x32xf32>
    %25 = tpu.matmul %8, %24, %cst_24 {dimension_numbers = #tpu.dot_dimension_numbers<[1], [0], [0], [1], [0, 0, 1, 1], [], []>} : vector<8x32xbf16>, vector<32x32xbf16>, vector<8x32xf32> -> vector<8x32xf32>
    %c0_25 = arith.constant 0 : index
    %c0_26 = arith.constant 0 : index
    %c0_27 = arith.constant 0 : index
    %26 = vector.load %arg11[%c0_25, %c0_26, %c0_27] : memref<1x1x32xf32, #tpu.memory_space<vmem>>, vector<1x1x32xf32>
    %27 = vector.shape_cast %26 : vector<1x1x32xf32> to vector<1x32xf32>
    %28 = vector.broadcast %27 : vector<1x32xf32> to vector<8x32xf32>
    %29 = arith.addf %25, %28 : vector<8x32xf32>
    %cst_28 = arith.constant 0.353553385 : f32
    %30 = vector.broadcast %cst_28 : f32 to vector<8x32xf32>
    %31 = arith.mulf %15, %30 : vector<8x32xf32>
    %32 = vector.extract_strided_slice %31 {offsets = [0, 0], sizes = [8, 8], strides = [1, 1]} : vector<8x32xf32> to vector<8x8xf32>
    %33 = arith.truncf %32 : vector<8x8xf32> to vector<8x8xbf16>
    %c0_29 = arith.constant 0 : index
    %c0_30 = arith.constant 0 : index
    %c0_31 = arith.constant 0 : index
    %c0_32 = arith.constant 0 : index
    %34 = vector.load %arg12[%c0_29, %c0_30, %c0_31, %c0_32] : memref<1x4x8x8xbf16, #tpu.memory_space<vmem>>, vector<1x1x8x8xbf16>
    %35 = vector.shape_cast %34 : vector<1x1x8x8xbf16> to vector<8x8xbf16>
    %36 = vector.shape_cast %33 : vector<8x8xbf16> to vector<1x1x8x8xbf16>
    tpu.vector_store %arg12[%c0_29, %c0_30, %c0_31, %c0_32], %36 {strides = array<i32>} : memref<1x4x8x8xbf16, #tpu.memory_space<vmem>>, vector<1x1x8x8xbf16>,
    %37 = vector.extract_strided_slice %22 {offsets = [0, 0], sizes = [8, 8], strides = [1, 1]} : vector<8x32xf32> to vector<8x8xf32>
    %38 = arith.truncf %37 : vector<8x8xf32> to vector<8x8xbf16>
    %c0_33 = arith.constant 0 : index
    %c0_34 = arith.constant 0 : index
    %c0_35 = arith.constant 0 : index
    %c0_36 = arith.constant 0 : index
    %39 = vector.load %arg13[%c0_33, %c0_34, %c0_35, %c0_36] : memref<1x4x8x8xbf16, #tpu.memory_space<vmem>>, vector<1x1x8x8xbf16>
    %40 = vector.shape_cast %39 : vector<1x1x8x8xbf16> to vector<8x8xbf16>
    %41 = vector.shape_cast %38 : vector<8x8xbf16> to vector<1x1x8x8xbf16>
    tpu.vector_store %arg13[%c0_33, %c0_34, %c0_35, %c0_36], %41 {strides = array<i32>} : memref<1x4x8x8xbf16, #tpu.memory_space<vmem>>, vector<1x1x8x8xbf16>,
    %42 = vector.extract_strided_slice %29 {offsets = [0, 0], sizes = [8, 8], strides = [1, 1]} : vector<8x32xf32> to vector<8x8xf32>
    %43 = arith.truncf %42 : vector<8x8xf32> to vector<8x8xbf16>
    %c0_37 = arith.constant 0 : index
    %c0_38 = arith.constant 0 : index
    %c0_39 = arith.constant 0 : index
    %c0_40 = arith.constant 0 : index
    %44 = vector.load %arg14[%c0_37, %c0_38, %c0_39, %c0_40] : memref<1x4x8x8xbf16, #tpu.memory_space<vmem>>, vector<1x1x8x8xbf16>
    %45 = vector.shape_cast %44 : vector<1x1x8x8xbf16> to vector<8x8xbf16>
    %46 = vector.shape_cast %43 : vector<8x8xbf16> to vector<1x1x8x8xbf16>
    tpu.vector_store %arg14[%c0_37, %c0_38, %c0_39, %c0_40], %46 {strides = array<i32>} : memref<1x4x8x8xbf16, #tpu.memory_space<vmem>>, vector<1x1x8x8xbf16>,
    %47 = vector.extract_strided_slice %31 {offsets = [0, 8], sizes = [8, 8], strides = [1, 1]} : vector<8x32xf32> to vector<8x8xf32>
    %48 = arith.truncf %47 : vector<8x8xf32> to vector<8x8xbf16>
    %c0_41 = arith.constant 0 : index
    %c1 = arith.constant 1 : index
    %c0_42 = arith.constant 0 : index
    %c0_43 = arith.constant 0 : index
    %49 = vector.load %arg12[%c0_41, %c1, %c0_42, %c0_43] : memref<1x4x8x8xbf16, #tpu.memory_space<vmem>>, vector<1x1x8x8xbf16>
    %50 = vector.shape_cast %49 : vector<1x1x8x8xbf16> to vector<8x8xbf16>
    %51 = vector.shape_cast %48 : vector<8x8xbf16> to vector<1x1x8x8xbf16>
    tpu.vector_store %arg12[%c0_41, %c1, %c0_42, %c0_43], %51 {strides = array<i32>} : memref<1x4x8x8xbf16, #tpu.memory_space<vmem>>, vector<1x1x8x8xbf16>,
    %52 = vector.extract_strided_slice %22 {offsets = [0, 8], sizes = [8, 8], strides = [1, 1]} : vector<8x32xf32> to vector<8x8xf32>
    %53 = arith.truncf %52 : vector<8x8xf32> to vector<8x8xbf16>
    %c0_44 = arith.constant 0 : index
    %c1_45 = arith.constant 1 : index
    %c0_46 = arith.constant 0 : index
    %c0_47 = arith.constant 0 : index
    %54 = vector.load %arg13[%c0_44, %c1_45, %c0_46, %c0_47] : memref<1x4x8x8xbf16, #tpu.memory_space<vmem>>, vector<1x1x8x8xbf16>
    %55 = vector.shape_cast %54 : vector<1x1x8x8xbf16> to vector<8x8xbf16>
    %56 = vector.shape_cast %53 : vector<8x8xbf16> to vector<1x1x8x8xbf16>
    tpu.vector_store %arg13[%c0_44, %c1_45, %c0_46, %c0_47], %56 {strides = array<i32>} : memref<1x4x8x8xbf16, #tpu.memory_space<vmem>>, vector<1x1x8x8xbf16>,
    %57 = vector.extract_strided_slice %29 {offsets = [0, 8], sizes = [8, 8], strides = [1, 1]} : vector<8x32xf32> to vector<8x8xf32>
    %58 = arith.truncf %57 : vector<8x8xf32> to vector<8x8xbf16>
    %c0_48 = arith.constant 0 : index
    %c1_49 = arith.constant 1 : index
    %c0_50 = arith.constant 0 : index
    %c0_51 = arith.constant 0 : index
    %59 = vector.load %arg14[%c0_48, %c1_49, %c0_50, %c0_51] : memref<1x4x8x8xbf16, #tpu.memory_space<vmem>>, vector<1x1x8x8xbf16>
    %60 = vector.shape_cast %59 : vector<1x1x8x8xbf16> to vector<8x8xbf16>
    %61 = vector.shape_cast %58 : vector<8x8xbf16> to vector<1x1x8x8xbf16>
    tpu.vector_store %arg14[%c0_48, %c1_49, %c0_50, %c0_51], %61 {strides = array<i32>} : memref<1x4x8x8xbf16, #tpu.memory_space<vmem>>, vector<1x1x8x8xbf16>,
    %62 = vector.extract_strided_slice %31 {offsets = [0, 16], sizes = [8, 8], strides = [1, 1]} : vector<8x32xf32> to vector<8x8xf32>
    %63 = arith.truncf %62 : vector<8x8xf32> to vector<8x8xbf16>
    %c0_52 = arith.constant 0 : index
    %c2 = arith.constant 2 : index
    %c0_53 = arith.constant 0 : index
    %c0_54 = arith.constant 0 : index
    %64 = vector.load %arg12[%c0_52, %c2, %c0_53, %c0_54] : memref<1x4x8x8xbf16, #tpu.memory_space<vmem>>, vector<1x1x8x8xbf16>
    %65 = vector.shape_cast %64 : vector<1x1x8x8xbf16> to vector<8x8xbf16>
    %66 = vector.shape_cast %63 : vector<8x8xbf16> to vector<1x1x8x8xbf16>
    tpu.vector_store %arg12[%c0_52, %c2, %c0_53, %c0_54], %66 {strides = array<i32>} : memref<1x4x8x8xbf16, #tpu.memory_space<vmem>>, vector<1x1x8x8xbf16>,
    %67 = vector.extract_strided_slice %22 {offsets = [0, 16], sizes = [8, 8], strides = [1, 1]} : vector<8x32xf32> to vector<8x8xf32>
    %68 = arith.truncf %67 : vector<8x8xf32> to vector<8x8xbf16>
    %c0_55 = arith.constant 0 : index
    %c2_56 = arith.constant 2 : index
    %c0_57 = arith.constant 0 : index
    %c0_58 = arith.constant 0 : index
    %69 = vector.load %arg13[%c0_55, %c2_56, %c0_57, %c0_58] : memref<1x4x8x8xbf16, #tpu.memory_space<vmem>>, vector<1x1x8x8xbf16>
    %70 = vector.shape_cast %69 : vector<1x1x8x8xbf16> to vector<8x8xbf16>
    %71 = vector.shape_cast %68 : vector<8x8xbf16> to vector<1x1x8x8xbf16>
    tpu.vector_store %arg13[%c0_55, %c2_56, %c0_57, %c0_58], %71 {strides = array<i32>} : memref<1x4x8x8xbf16, #tpu.memory_space<vmem>>, vector<1x1x8x8xbf16>,
    %72 = vector.extract_strided_slice %29 {offsets = [0, 16], sizes = [8, 8], strides = [1, 1]} : vector<8x32xf32> to vector<8x8xf32>
    %73 = arith.truncf %72 : vector<8x8xf32> to vector<8x8xbf16>
    %c0_59 = arith.constant 0 : index
    %c2_60 = arith.constant 2 : index
    %c0_61 = arith.constant 0 : index
    %c0_62 = arith.constant 0 : index
    %74 = vector.load %arg14[%c0_59, %c2_60, %c0_61, %c0_62] : memref<1x4x8x8xbf16, #tpu.memory_space<vmem>>, vector<1x1x8x8xbf16>
    %75 = vector.shape_cast %74 : vector<1x1x8x8xbf16> to vector<8x8xbf16>
    %76 = vector.shape_cast %73 : vector<8x8xbf16> to vector<1x1x8x8xbf16>
    tpu.vector_store %arg14[%c0_59, %c2_60, %c0_61, %c0_62], %76 {strides = array<i32>} : memref<1x4x8x8xbf16, #tpu.memory_space<vmem>>, vector<1x1x8x8xbf16>,
    %77 = vector.extract_strided_slice %31 {offsets = [0, 24], sizes = [8, 8], strides = [1, 1]} : vector<8x32xf32> to vector<8x8xf32>
    %78 = arith.truncf %77 : vector<8x8xf32> to vector<8x8xbf16>
    %c0_63 = arith.constant 0 : index
    %c3 = arith.constant 3 : index
    %c0_64 = arith.constant 0 : index
    %c0_65 = arith.constant 0 : index
    %79 = vector.load %arg12[%c0_63, %c3, %c0_64, %c0_65] : memref<1x4x8x8xbf16, #tpu.memory_space<vmem>>, vector<1x1x8x8xbf16>
    %80 = vector.shape_cast %79 : vector<1x1x8x8xbf16> to vector<8x8xbf16>
    %81 = vector.shape_cast %78 : vector<8x8xbf16> to vector<1x1x8x8xbf16>
    tpu.vector_store %arg12[%c0_63, %c3, %c0_64, %c0_65], %81 {strides = array<i32>} : memref<1x4x8x8xbf16, #tpu.memory_space<vmem>>, vector<1x1x8x8xbf16>,
    %82 = vector.extract_strided_slice %22 {offsets = [0, 24], sizes = [8, 8], strides = [1, 1]} : vector<8x32xf32> to vector<8x8xf32>
    %83 = arith.truncf %82 : vector<8x8xf32> to vector<8x8xbf16>
    %c0_66 = arith.constant 0 : index
    %c3_67 = arith.constant 3 : index
    %c0_68 = arith.constant 0 : index
    %c0_69 = arith.constant 0 : index
    %84 = vector.load %arg13[%c0_66, %c3_67, %c0_68, %c0_69] : memref<1x4x8x8xbf16, #tpu.memory_space<vmem>>, vector<1x1x8x8xbf16>
    %85 = vector.shape_cast %84 : vector<1x1x8x8xbf16> to vector<8x8xbf16>
    %86 = vector.shape_cast %83 : vector<8x8xbf16> to vector<1x1x8x8xbf16>
    tpu.vector_store %arg13[%c0_66, %c3_67, %c0_68, %c0_69], %86 {strides = array<i32>} : memref<1x4x8x8xbf16, #tpu.memory_space<vmem>>, vector<1x1x8x8xbf16>,
    %87 = vector.extract_strided_slice %29 {offsets = [0, 24], sizes = [8, 8], strides = [1, 1]} : vector<8x32xf32> to vector<8x8xf32>
    %88 = arith.truncf %87 : vector<8x8xf32> to vector<8x8xbf16>
    %c0_70 = arith.constant 0 : index
    %c3_71 = arith.constant 3 : index
    %c0_72 = arith.constant 0 : index
    %c0_73 = arith.constant 0 : index
    %89 = vector.load %arg14[%c0_70, %c3_71, %c0_72, %c0_73] : memref<1x4x8x8xbf16, #tpu.memory_space<vmem>>, vector<1x1x8x8xbf16>
    %90 = vector.shape_cast %89 : vector<1x1x8x8xbf16> to vector<8x8xbf16>
    %91 = vector.shape_cast %88 : vector<8x8xbf16> to vector<1x1x8x8xbf16>
    tpu.vector_store %arg14[%c0_70, %c3_71, %c0_72, %c0_73], %91 {strides = array<i32>} : memref<1x4x8x8xbf16, #tpu.memory_space<vmem>>, vector<1x1x8x8xbf16>,
    return
  }
  func.func @transform_0(%arg0: i32, %arg1: i32, %arg2: i32) -> (i32, i32, i32) {
    %c0_i32 = arith.constant 0 : i32
    %c0_i32_0 = arith.constant 0 : i32
    return %arg1, %arg2, %c0_i32 : i32, i32, i32
  }
  func.func @transform_1(%arg0: i32, %arg1: i32, %arg2: i32) -> (i32, i32, i32) {
    %c0_i32 = arith.constant 0 : i32
    %c0_i32_0 = arith.constant 0 : i32
    return %arg1, %arg2, %c0_i32 : i32, i32, i32
  }
  func.func @transform_2(%arg0: i32, %arg1: i32, %arg2: i32) -> (i32, i32, i32) {
    %c0_i32 = arith.constant 0 : i32
    %c0_i32_0 = arith.constant 0 : i32
    return %arg1, %arg2, %c0_i32 : i32, i32, i32
  }
  func.func @transform_3(%arg0: i32, %arg1: i32, %arg2: i32) -> (i32, i32, i32) {
    %c0_i32 = arith.constant 0 : i32
    %c0_i32_0 = arith.constant 0 : i32
    %c0_i32_1 = arith.constant 0 : i32
    return %arg0, %c0_i32, %c0_i32_0 : i32, i32, i32
  }
  func.func @transform_4(%arg0: i32, %arg1: i32, %arg2: i32) -> (i32, i32, i32) {
    %c0_i32 = arith.constant 0 : i32
    %c0_i32_0 = arith.constant 0 : i32
    %c0_i32_1 = arith.constant 0 : i32
    return %arg0, %c0_i32, %c0_i32_0 : i32, i32, i32
  }
  func.func @transform_5(%arg0: i32, %arg1: i32, %arg2: i32) -> (i32, i32, i32) {
    %c0_i32 = arith.constant 0 : i32
    %c0_i32_0 = arith.constant 0 : i32
    %c0_i32_1 = arith.constant 0 : i32
    return %arg0, %c0_i32, %c0_i32_0 : i32, i32, i32
  }
  func.func @transform_6(%arg0: i32, %arg1: i32, %arg2: i32) -> (i32, i32, i32) {
    %c0_i32 = arith.constant 0 : i32
    %c0_i32_0 = arith.constant 0 : i32
    %c0_i32_1 = arith.constant 0 : i32
    return %arg0, %c0_i32, %c0_i32_0 : i32, i32, i32
  }
  func.func @transform_7(%arg0: i32, %arg1: i32, %arg2: i32) -> (i32, i32, i32) {
    %c0_i32 = arith.constant 0 : i32
    %c0_i32_0 = arith.constant 0 : i32
    %c0_i32_1 = arith.constant 0 : i32
    return %arg0, %c0_i32, %c0_i32_0 : i32, i32, i32
  }
  func.func @transform_8(%arg0: i32, %arg1: i32, %arg2: i32) -> (i32, i32, i32) {
    %c0_i32 = arith.constant 0 : i32
    %c0_i32_0 = arith.constant 0 : i32
    %c0_i32_1 = arith.constant 0 : i32
    return %arg0, %c0_i32, %c0_i32_0 : i32, i32, i32
  }
  func.func @transform_9(%arg0: i32, %arg1: i32, %arg2: i32) -> (i32, i32, i32, i32) {
    %c0_i32 = arith.constant 0 : i32
    %c0_i32_0 = arith.constant 0 : i32
    return %arg1, %arg0, %arg2, %c0_i32 : i32, i32, i32, i32
  }
  func.func @transform_10(%arg0: i32, %arg1: i32, %arg2: i32) -> (i32, i32, i32, i32) {
    %c0_i32 = arith.constant 0 : i32
    %c0_i32_0 = arith.constant 0 : i32
    return %arg1, %arg0, %arg2, %c0_i32 : i32, i32, i32, i32
  }
  func.func @transform_11(%arg0: i32, %arg1: i32, %arg2: i32) -> (i32, i32, i32, i32) {
    %c0_i32 = arith.constant 0 : i32
    %c0_i32_0 = arith.constant 0 : i32
    return %arg1, %arg0, %arg2, %c0_i32 : i32, i32, i32, i32
  }
}

</mosaic_0001>

<bundles_post_ra>
// kernel: tpu_custom_call.1
= control target key start
LH: loop header
LB: loop body
LE: loop exit
PB: predicated region body
PF: predicated region fallthrough
CT: control target
= control target key end

     0   :  { %s2107_s0 = inlined_call_operand.hbm [shape: f32[2,8,32], index: 0, kind: input, shape index: {}]   ;;  %s2108_s1 = inlined_call_operand.hbm [shape: f32[2,8,32], index: 1, kind: input, shape index: {}]   ;;  %s2109_s2 = inlined_call_operand.hbm [shape: f32[2,8,32], index: 2, kind: input, shape index: {}]   ;;  %s2110_s3 = inlined_call_operand.hbm [shape: bf16[1,32,32], index: 3, kind: input, shape index: {}]   ;;  %s2111_s4 = inlined_call_operand.hbm [shape: bf16[1,32,32], index: 4, kind: input, shape index: {}]   ;;  %s2112_s5 = inlined_call_operand.hbm [shape: bf16[1,32,32], index: 5, kind: input, shape index: {}]   ;;  %s2113_s6 = inlined_call_operand.vmem [shape: f32[1,1,32], index: 6, kind: input, shape index: {}]   ;;  %s2114_s7 = inlined_call_operand.vmem [shape: f32[1,1,32], index: 7, kind: input, shape index: {}]   ;;  %s2115_s8 = inlined_call_operand.vmem [shape: f32[1,1,32], index: 8, kind: input, shape index: {}]   ;;  %s2116_s9 = inlined_call_operand.hbm [shape: bf16[2,4,8,8], index: 9, kind: output, shape index: {0}]   ;;  %s2117_s10 = inlined_call_operand.hbm [shape: bf16[2,4,8,8], index: 10, kind: output, shape index: {1}]   ;;  %s2118_s11 = inlined_call_operand.hbm [shape: bf16[2,4,8,8], index: 11, kind: output, shape index: {2}]  }
   0x1   :  { %2136 = sst [smem:[#allocation31_spill]] %s2108_s1 }
   0x2   :  { %2137 = sst [smem:[#allocation32_spill]] %s2110_s3 }
   0x3   :  { %2138 = sst [smem:[#allocation33_spill]] %s2111_s4 }
   0x4   :  { %2139 = sst [smem:[#allocation34_spill]] %s2112_s5 }
   0x5   :  { %2140 = sst [smem:[#allocation35_spill]] %s2116_s9 }
   0x6   :  { %2141 = sst [smem:[#allocation36_spill]] %s2117_s10 }
   0x7   :  { %2142 = sst [smem:[#allocation37_spill]] %s2118_s11 }
   0x8   :  { %17 = vsyncpa [#allocation3], 0 }
   0x9   :  { %19 = vsyncpa [#allocation3 + $0x1], 0 }
   0xa   :  { %20 = vsyncpa [#allocation6], 0 }
   0xb   :  { %22 = vsyncpa [#allocation6 + $0x1], 0 }
   0xc   :  { %23 = vsyncpa [#allocation9], 0 }
   0xd   :  { %24 = vsyncpa [#allocation12], 0 }
   0xe   :  { %25 = vsyncpa [#allocation4], 0 }
   0xf   :  { %27 = vsyncpa [#allocation4 + $0x1], 0 }
  0x10   :  { %28 = vsyncpa [#allocation15], 0 }
  0x11   :  { %30 = vsyncpa [#allocation15 + $0x1], 0  ;;  %s1784_s17 = smov 0   ;;  %s1786_s18 = smov 0  }
  0x12   :  { %s1788_s19 = smov 0   ;;  %s1790_s20 = smov 0  }
  0x13   :  { %s1792_s21 = smov 0   ;;  %s1794_s22 = smov 0  }
  0x14 LB: > { %2143 = sst [smem:[#allocation23_spill]] %s1692_s17  ;;  %s1815_s23 = sadd.s32 4294967295, %s1712_s22   ;;  %s1712_s22 = sphi %s1794_s22, %s36_s22   ;;  %s1708_s21 = sphi %s1792_s21, %s2177_s21   ;;  %s1704_s20 = sphi %s1790_s20, %s2176_s20   ;;  %s1700_s19 = sphi %s1788_s19, %s2180_s19   ;;  %s1696_s18 = sphi %s1786_s18, %s2179_s18   ;;  %s1692_s17 = sphi %s1784_s17, %s2178_s17  }
  0x15   : > { %2144 = sst [smem:[#allocation24_spill]] %s1704_s20  ;;  %p1175_p0 = scmp.ge.s32.totalorder %s1712_s22, 1 }
  0x16   : > { %2145 = sst [smem:[#allocation25_spill]] %s1708_s21  ;;  %p78_p1 = scmp.eq.s32.totalorder %s1815_s23, 0 }
  0x17   : > { %2146 = sst [smem:[#allocation26_spill]] %s1712_s22  ;;  %p390_p2 = scmp.lt.s32.totalorder %s1712_s22, 3 }
  0x18   : > { %s2147_s3 = sld [smem:[#allocation32_spill]]  ;;  %s1714_s28 = smov [#allocation8]  }
  0x19   : > { %p1823_p3 = pnand %p1175_p0, %p390_p2  ;;  %s406_s29 = sshll.u32 %s1714_s28, 4  ;;  %s407_s29 = int_to_ptr.vmem [resolvable:$true] %s406_s29 }
  0x1a   : > { %p1182_p6 = scmp.ge.s32.totalorder %s1712_s22, 2  ;;  %s2119_s12 = smov 64  }
  0x1b   : > { %p1279_p4 = pneg %p1823_p3  ;;  %s2121_s13 = smov 4  }
  0x1c   : > { %s2124_s14 = sadd.s32 4294967294, %s1712_s22   ;;  %s51_s15 = sadd.s32 1, %s1708_s21 }
  0x1d   : > { %p1831_p5 = pnand %p1279_p4, %p78_p1  ;;  %s64_s16 = sadd.s32 1, %s1700_s19 }
  0x1e   : > { %s404_s26 = sshll.u32 %s2147_s3, 4  ;;  %p53_p7 = scmp.ge.s32.totalorder %s51_s15, 2  ;;  %s405_s26 = int_to_ptr.hbm [resolvable:$true] %s404_s26 }
  0x1f   : > { %1282 = dma.hbm_to_vmem [thread:$0]  (!%p1831_p5), %s405_s26, 256, %s407_s29, [#allocation9], %s2119_s12, %s2119_s12, %s2121_s13  }
  0x20   : > { %p71_p8 = scmp.ne.s32.totalorder %s1700_s19, %s1696_s18  ;;  %p72_p9 = scmp.eq.s32.totalorder %s1712_s22, 0 }
  0x21   : > { %p77_p10 = scmp.ne.s32.totalorder %s1696_s18, %s1692_s17  ;;  %s2182_s15 = smov (%p53_p7, %s51_s15), 0 }
  0x22   : > { %2150 = sst [smem:[#allocation27_spill]] %s2182_s15  ;;  %p1851_p11 = por %p72_p9, %p71_p8 }
  0x23   : > { %p1857_p12 = por %p78_p1, %p77_p10  ;;  %s59_s26 = ssub.s32 %s1708_s21, %s2182_s15 }
  0x24   : > { %p317_p13 = scmp.eq.s32.totalorder %s1815_s23, 1  ;;  %p62_p0 = scmp.eq.s32.totalorder %s59_s26, 0 }
  0x25   : > { %p323_p2 = scmp.eq.s32.totalorder %s2124_s14, 1  ;;  %p1312_p7 = scmp.lt.s32.totalorder %s1712_s22, 2 }
  0x26   : > { %p1866_p4 = por %p317_p13, %p71_p8  ;;  %s2128_s13 = sand.u32 1, %s1700_s19  }
  0x27   : > { %s1872_s29 = scalar_select %p62_p0, %s1700_s19, %s64_s16  }
  0x28   : > { %s2153_s28 = scalar_select %p1866_p4, 1, 0 }
  0x29   : > { %2155 = sst [smem:[#allocation29_spill]] %s1872_s29  ;;  %p1874_p9 = por %p323_p2, %p77_p10 }
  0x2a   : > { %2154 = sst [smem:[#allocation28_spill]] %s2153_s28  ;;  %s1881_s3 = sshll.u32 %s2128_s13, 3 }
  0x2b   : > { %s2156_s12 = scalar_select %p1874_p9, 1, 0 }
  0x2c   : > { %s1884_s15 = sshll.u32 %s1708_s21, 3  ;;  %p1888_p8 = pnand %p1312_p7, %p1851_p11 }
  0x2d   : > { %2157 = sst [smem:[#allocation30_spill]] %s2156_s12  ;;  %s492_s16 = sand.u32 1, %s1712_s22  }
  0x2e   : > { %s2159_s1 = sld [smem:[#allocation31_spill]]  ;;  %s496_s9 = scalar_lea.vmem [#allocation5], %s1881_s3 }
  0x2f   : > { %s505_s13 = sshll.u32 %s496_s9, 4  ;;  %s1898_s24 = scalar_lea.sflag [#allocation6], %s492_s16  ;;  %s506_s13 = int_to_ptr.vmem [resolvable:$true] %s505_s13 }
  0x30   : > { %s2160_s4 = sld [smem:[#allocation33_spill]]  ;;  %s1717_s14 = smov [#allocation10]  }
  0x31   : > { %s2161_s5 = sld [smem:[#allocation34_spill]]  ;;  %s2162_s16 = smov 4  }
  0x32   : > { %s2163_s28 = smov 64   ;;  %s1718_s11 = smov [#allocation11]  }
  0x33   : > { %s476_s9 = scalar_lea.vmem [#allocation2], %s1881_s3  ;;  %s516_s10 = scalar_lea.vmem [#allocation7], %s1881_s3 }
  0x34   : > { %s501_s12 = scalar_lea.hbm %s2159_s1, %s1884_s15  ;;  %s485_s29 = sshll.u32 %s476_s9, 4  ;;  %s486_s29 = int_to_ptr.vmem [resolvable:$true] %s485_s29 }
  0x35   : > { %s503_s17 = sshll.u32 %s501_s12, 4  ;;  %s423_s12 = sshll.u32 %s1717_s14, 4  ;;  %s504_s17 = int_to_ptr.hbm [resolvable:$true] %s503_s17  ;;  %s424_s12 = int_to_ptr.vmem [resolvable:$true] %s423_s12 }
  0x36   : > { %1295 = dma.hbm_to_vmem [thread:$0]  (!%p1888_p8), %s504_s17, 128, %s506_s13, %s1898_s24  }
  0x37   : > { %s421_s22 = sshll.u32 %s2160_s4, 4  ;;  %s438_s1 = sshll.u32 %s2161_s5, 4  ;;  %s422_s22 = int_to_ptr.hbm [resolvable:$true] %s421_s22  ;;  %s439_s1 = int_to_ptr.hbm [resolvable:$true] %s438_s1 }
  0x38   : > { %1285 = dma.hbm_to_vmem [thread:$0]  (!%p1831_p5), %s422_s22, 256, %s424_s12, [#allocation9], %s2163_s28, %s2163_s28, %s2162_s16  }
  0x39   : > { %s440_s17 = sshll.u32 %s1718_s11, 4  ;;  %s481_s14 = scalar_lea.hbm %s2107_s0, %s1884_s15  ;;  %s441_s17 = int_to_ptr.vmem [resolvable:$true] %s440_s17 }
  0x3a   : > { %1288 = dma.hbm_to_vmem [thread:$0]  (!%p1831_p5), %s439_s1, 256, %s441_s17, [#allocation12], %s2163_s28, %s2163_s28, %s2162_s16  }
  0x3b   : > { %s483_s4 = sshll.u32 %s481_s14, 4  ;;  %s2164_s22 = sand.u32 1, %s1700_s19   ;;  %s484_s4 = int_to_ptr.hbm [resolvable:$true] %s483_s4 }
  0x3c   : > { %s473_s12 = scalar_lea.sflag [#allocation3], %s2164_s22  ;;  %s521_s5 = scalar_lea.hbm %s2109_s2, %s1884_s15 }
  0x3d   : > { %1292 = dma.hbm_to_vmem [thread:$0]  (!%p1888_p8), %s484_s4, 128, %s486_s29, %s473_s12  }
  0x3e   : > { %s525_s20 = sshll.u32 %s516_s10, 4  ;;  %s523_s1 = sshll.u32 %s521_s5, 4  ;;  %s526_s20 = int_to_ptr.vmem [resolvable:$true] %s525_s20  ;;  %s524_s1 = int_to_ptr.hbm [resolvable:$true] %s523_s1 }
  0x3f   : > { %1298 = dma.hbm_to_vmem [thread:$0]  (!%p1888_p8), %s524_s1, 128, %s526_s20, %s1898_s24  }
  0x40   : > { %534 = sbr.rel (%p1823_p3) target bundleno = 369 (0x171), region = 56  ;;  %s1939_s28 = sand.u32 (!%p1823_p3), 1, %s1696_s18  }
  0x41   : > { %s1190_s4 = sshll.u32 (!%p1823_p3), %s1939_s28, 3  ;;  %s537_s16 = scalar_lea.sflag (!%p1823_p3), [#allocation3], %s1939_s28 }
  0x42   : > { %s540_s17 = scalar_lea.vmem (!%p1823_p3), [#allocation2], %s1190_s4 }
  0x45   : > { %1667 = dma.done.wait (%p1857_p12), %s537_s16, 128  }
  0x46   : > { %1669 = vsyncadd (%p1857_p12), %s537_s16, 4294967168  ;;  %s546_s3 = sand.u32 1, %s1815_s23   ;;  %s550_s10 = scalar_lea.vmem [#allocation5], %s1190_s4 }
  0x47   : > { %s547_s5 = scalar_lea.sflag [#allocation6], %s546_s3 }
  0x48   : > { %1671 = dma.done.wait (%p1857_p12), %s547_s5, 256  }
  0x49   : > { %1673 = vsyncadd (%p1857_p12), %s547_s5, 4294967040  ;;  %s560_s20 = scalar_lea.vmem [#allocation7], %s1190_s4 }
  0x4a   : > { %1675 = dma.done.wait (%p78_p1), [#allocation9], 512  }
  0x4b   : > { %1677 = vsyncadd (%p78_p1), [#allocation9], 4294966784 }
  0x4c   : > { %1679 = dma.done.wait (%p78_p1), [#allocation12], 256  }
  0x4d   : > { %1681 = vsyncadd (%p78_p1), [#allocation12], 4294967040  ;;  %v1247_v0 = vld [vmem:[#allocation8 + $0x8] sm:$0xff]  ;;  %v1249_v1 = vld [vmem:[#allocation10 + $0x8] sm:$0xff]  ;;  %vm683_vm0 = vcmask 261120   ;;  %s1196_s24 = sshll.u32 %s1939_s28, 4 }
  0x4e   : > { %v1251_v2 = vld [vmem:[#allocation11 + $0x8] sm:$0xff]  ;;  %v1246_v3 = vld [vmem:[#allocation8] sm:$0xff]  ;;  %v1248_v4 = vld [vmem:[#allocation10] sm:$0xff]  ;;  %693 = vmatpush.bf16.msra.mxu0 %v1247_v0  ;;  %729 = vmatpush.bf16.msra.mxu1 %v1249_v1  ;;  %vm774_vm1 = vcmask 60416   ;;  %s1972_s14 = scalar_lea.vmem [#allocation14], %s1196_s24  ;;  %s1719_s9 = smov 104  }
  0x4f   : > { %v1250_v5 = vld [vmem:[#allocation11] sm:$0xff]  ;;  %v657_v6 = vld [vmem:[%s540_s17] sm:$0xff]  ;;  %765 = vmatpush.bf16.msra.mxu2 %v1251_v2  ;;  %s1720_s29 = smov 120   ;;  %s1976_s22 = scalar_lea.vmem [#allocation13], %s1196_s24 }
  0x50   : > { %v659_v7 = vld [vmem:[%s550_s10] sm:$0xff]  ;;  %v661_v8 = vld [vmem:[%s560_s20] sm:$0xff]  ;;  %v658_v9 = vpack.c.bf16 %v657_v6, %v657_v6  ;;  %s1721_s12 = smov 112   ;;  %s2165_s30 = sld [smem:[#allocation24_spill]] }
  0x51   : > { %v660_v10 = vpack.c.bf16 %v659_v7, %v659_v7  ;;  %v662_v11 = vpack.c.bf16 %v661_v8, %v661_v8  ;;  %v1375_v12 = vld [vmem:[%s2113_s6] ss:$0 sm:$0xff]  ;;  %s1980_s11 = scalar_lea.vmem [#allocation16], %s1196_s24  ;;  %s2166_s17 = sld [smem:[#allocation36_spill]] }
  0x52   : > { %694 = vmatpush.bf16.msra.mxu0 %v1246_v3  ;;  %730 = vmatpush.bf16.msra.mxu1 %v1248_v4  ;;  %v1376_v13 = vld [vmem:[%s2114_s7] ss:$0 sm:$0xff]  ;;  %s874_s27 = sshll.u32 %s1972_s14, 4  ;;  %s2169_s24 = sld [smem:[#allocation37_spill]]  ;;  %s875_s27 = int_to_ptr.vmem [resolvable:$true] %s874_s27 }
  0x53   : > { %766 = vmatpush.bf16.msra.mxu2 %v1250_v5  ;;  %v1377_v20 = vld [vmem:[%s2115_s8] ss:$0 sm:$0xff] }
  0x55   : > { %1207 = vmatmul.msk.bf16.vlgmr.msra.gmra.mxu0 %vm683_vm0, %v658_v9  ;;  %1216 = vmatmul.msk.bf16.vlgmr.msra.gmra.mxu1 %vm683_vm0, %v660_v10 }
  0x56   : > { %1225 = vmatmul.msk.bf16.vlgmr.msra.gmra.mxu2 %vm683_vm0, %v662_v11  ;;  %s1991_s1 = sshll.u32 %s2165_s30, 4  ;;  %s2019_s30 = scalar_lea.sflag [#allocation15], %s546_s3 }
  0x57   : > { %s2167_s5 = smov %s2166_s17  ;;  %s873_s10 = scalar_lea.hbm %s2166_s17, %s1991_s1 }
  0x58   : > { %s2002_s15 = sshll.u32 %s873_s10, 4  ;;  %s893_s21 = scalar_lea.hbm %s2169_s24, %s1991_s1  ;;  %s877_s15 = int_to_ptr.hbm [resolvable:$true] %s2002_s15 }
  0x59   : > { %s1572_s4 = sshra.s32 %s877_s15, 4  ;;  %s1578_s10 = scalar_lea.hbm %s2167_s5, 32  ;;  %s1573_s4 = int_to_ptr.hbm [resolvable:$true] %s1572_s4 }
  0x5a   : > { %s1574_s16 = scalar_lea.hbm %s1573_s4, 16  ;;  %p1579_p10 = scmp.lt.s32.totalorder %s1573_s4, %s2167_s5 }
  0x5b   : > { %p1575_p1 = scmp.ne.s32.totalorder %s1573_s4, %s1574_s16  ;;  %p1580_p11 = scmp.lt.s32.totalorder %s1578_s10, %s1574_s16 }
  0x5d   : > { %p1576_p3 = pnand %p1575_p1, %p1866_p4  ;;  %p1581_p12 = por %p1580_p11, %p1579_p10 }
  0x5f   : > { %p1577_p5 = pneg %p1576_p3 }
  0x61   : > { %p1582_p13 = pnand %p1581_p12, %p1577_p5 }
  0xd2   : > { %v696_v14 = vpop.f32.mrf.mxu0  ;;  %v732_v15 = vpop.f32.mrf.mxu1 }
  0xd3   : > { %v697_v16 = vadd.f32 %v1375_v12, %v696_v14  ;;  %v733_v17 = vadd.f32 %v1376_v13, %v732_v15 }
  0xd5   : > { %v772_v18 = vmul.f32 0.35355338, %v697_v16  ;;  %v776_v19 = vpack.c.bf16 %v733_v17, %v733_v17 }
  0xd7   : > { %v773_v21 = vpack.c.bf16 %v772_v18, %v772_v18  ;;  %777 = vst.msk [vmem:[%s1972_s14] sm:$0xf] %vm774_vm1, %v776_v19  ;;  %818 = vrot.lane.b32.xlu1 %v776_v19, %s1719_s9  ;;  %787 = vrot.lane.b32.xlu0 %v776_v19, %s1720_s29 }
  0xd9   : > { %775 = vst.msk [vmem:[%s1976_s22] sm:$0xf] %vm774_vm1, %v773_v21  ;;  %798 = vrot.lane.b32.xlu2 %v773_v21, %s1721_s12  ;;  %v768_v22 = vpop.f32.mrf.mxu2 }
  0xda   : > { %v698_v23 = vpop.f32.mrf.mxu0  ;;  %v734_v24 = vpop.f32.mrf.mxu1  ;;  %v769_v25 = vadd.f32 %v1377_v20, %v768_v22 }
  0xdc   : > { %v778_v26 = vpack.c.bf16 %v769_v25, %v769_v25 }
  0xde   : > { %779 = vst.msk [vmem:[%s1980_s11] sm:$0xf] %vm774_vm1, %v778_v26 }
  0xdf   : > { %803 = vrot.lane.b32.xlu0 %v776_v19, %s1721_s12  ;;  %781 = vrot.lane.b32.xlu1 %v773_v21, %s1720_s29 }
  0xe1   : > { %793 = vrot.lane.b32.xlu2 %v778_v26, %s1720_s29  ;;  %v770_v27 = vpop.f32.mrf.mxu2  ;;  %s2170_s29 = sld [smem:[#allocation35_spill]] }
  0xe7   : > { %808 = vrot.lane.b32.xlu0 %v778_v26, %s1721_s12  ;;  %813 = vrot.lane.b32.xlu1 %v773_v21, %s1719_s9  ;;  %s853_s12 = scalar_lea.hbm %s2170_s29, %s1991_s1 }
  0xe9   : > { %823 = vrot.lane.b32.xlu2 %v778_v26, %s1719_s9 }
 0x133   : > { %v799_v28 = vpop.permute.xlu2 %798 }
 0x134   : > { %1229 = vst.msk [vmem:[%s1976_s22 + $0x8] sm:$0xf] %vm774_vm1, %v799_v28 }
 0x13b   : > { %v794_v29 = vpop.permute.xlu2 %793 }
 0x13c   : > { %1228 = vst.msk [vmem:[%s1980_s11 + $0x4] sm:$0xf] %vm774_vm1, %v794_v29 }
 0x143   : > { %v824_v30 = vpop.permute.xlu2 %823 }
 0x144   : > { %1234 = vst.msk [vmem:[%s1980_s11 + $0xc] sm:$0xf] %vm774_vm1, %v824_v30 }
 0x149   : > { %v819_v31 = vpop.permute.xlu1 %818  ;;  %v788_v32 = vpop.permute.xlu0 %787 }
 0x14a   : > { %1233 = vst.msk [vmem:[%s1972_s14 + $0xc] sm:$0xf] %vm774_vm1, %v819_v31 }
 0x14b   : > { %1227 = vst.msk [vmem:[%s1972_s14 + $0x4] sm:$0xf] %vm774_vm1, %v788_v32 }
 0x151   : > { %v804_v33 = vpop.permute.xlu0 %803  ;;  %v782_v34 = vpop.permute.xlu1 %781 }
 0x152   : > { %1230 = vst.msk [vmem:[%s1972_s14 + $0x8] sm:$0xf] %vm774_vm1, %v804_v33 }
 0x153   : > { %1226 = vst.msk [vmem:[%s1976_s22 + $0x4] sm:$0xf] %vm774_vm1, %v782_v34 }
 0x154   : > { %1585 = shalt.err (!%p1582_p13)
}
 0x155   : > { %s1722_s23 = smov 64   ;;  %s1723_s3 = smov 4  }
 0x156   : > { %1274 = dma.vmem_to_hbm [thread:$0]  (%p1866_p4), %s875_s27, 256, %s877_s15, %s2019_s30, %s1722_s23, %s1722_s23, %s1723_s3  }
 0x157   : > { %s854_s1 = sshll.u32 %s1976_s22, 4  ;;  %s2036_s13 = sshll.u32 %s853_s12, 4  ;;  %s855_s1 = int_to_ptr.vmem [resolvable:$true] %s854_s1  ;;  %s857_s13 = int_to_ptr.hbm [resolvable:$true] %s2036_s13 }
 0x158   : > { %s894_s9 = sshll.u32 %s1980_s11, 4  ;;  %s2039_s4 = sshll.u32 %s893_s21, 4  ;;  %s2042_s9 = int_to_ptr.vmem [resolvable:$true] %s894_s9  ;;  %s897_s4 = int_to_ptr.hbm [resolvable:$true] %s2039_s4 }
 0x159   : > { %v809_v35 = vpop.permute.xlu0 %808  ;;  %v814_v36 = vpop.permute.xlu1 %813  ;;  %s829_s27 = scalar_lea.sflag [#allocation4], %s1939_s28  ;;  %s1600_s15 = sshra.s32 %s857_s13, 4  ;;  %s1601_s15 = int_to_ptr.hbm [resolvable:$true] %s1600_s15 }
 0x15a   : > { %1231 = vst.msk [vmem:[%s1980_s11 + $0x8] sm:$0xf] %vm774_vm1, %v809_v35  ;;  %s1602_s12 = scalar_lea.hbm %s1601_s15, 16  ;;  %s1606_s14 = scalar_lea.hbm %s2170_s29, 32 }
 0x15b   : > { %1232 = vst.msk [vmem:[%s1976_s22 + $0xc] sm:$0xf] %vm774_vm1, %v814_v36  ;;  %p1603_p0 = scmp.ne.s32.totalorder %s1601_s15, %s1602_s12  ;;  %p1607_p8 = scmp.lt.s32.totalorder %s1601_s15, %s2170_s29 }
 0x15c   : > { %p1608_p1 = scmp.lt.s32.totalorder %s1606_s14, %s1602_s12 }
 0x15d   : > { %p1604_p2 = pnand %p1603_p0, %p1866_p4 }
 0x15e   : > { %p1609_p3 = por %p1608_p1, %p1607_p8 }
 0x15f   : > { %p1605_p7 = pneg %p1604_p2 }
 0x161   : > { %p1610_p5 = pnand %p1609_p3, %p1605_p7 }
 0x163   : > { %1613 = shalt.err (!%p1610_p5)
}
 0x164   : > { %1273 = dma.vmem_to_hbm [thread:$0]  (%p1866_p4), %s855_s1, 256, %s857_s13, %s829_s27, %s1722_s23, %s1722_s23, %s1723_s3  }
 0x165   : > { %s1628_s28 = sshra.s32 %s897_s4, 4  ;;  %s1634_s26 = scalar_lea.hbm %s2169_s24, 32  ;;  %s1629_s28 = int_to_ptr.hbm [resolvable:$true] %s1628_s28 }
 0x166   : > { %s1630_s22 = scalar_lea.hbm %s1629_s28, 16  ;;  %p1635_p13 = scmp.lt.s32.totalorder %s1629_s28, %s2169_s24 }
 0x167   : > { %p1631_p10 = scmp.ne.s32.totalorder %s1629_s28, %s1630_s22  ;;  %p1636_p0 = scmp.lt.s32.totalorder %s1634_s26, %s1630_s22 }
 0x169   : > { %p1632_p11 = pnand %p1631_p10, %p1866_p4  ;;  %p1637_p2 = por %p1636_p0, %p1635_p13 }
 0x16b   : > { %p1633_p12 = pneg %p1632_p11 }
 0x16d   : > { %p1638_p7 = pnand %p1637_p2, %p1633_p12 }
 0x16f   : > { %1641 = shalt.err (!%p1638_p7)
}
 0x170   : > { %1275 = dma.vmem_to_hbm [thread:$0]  (%p1866_p4), %s2042_s9, 256, %s897_s4, %s2019_s30, %s1722_s23, %s1722_s23, %s1723_s3  }
 0x171 PF: > { %s2171_s1 = sld [smem:[#allocation23_spill]]  ;;  %p1300_p8 = pnand %p1182_p6, %p1874_p9 }
 0x172   : > { %s2173_s27 = sld [smem:[#allocation26_spill]] }
 0x173   : > { %p1301_p1 = pneg %p1300_p8 }
 0x177   : > { %s911_s21 = sand.u32 1, %s2171_s1  }
 0x178   : > { %s912_s16 = scalar_lea.sflag [#allocation4], %s911_s21 }
 0x179   : > { %1683 = dma.done.wait (%p1301_p1), %s912_s16, 256  }
 0x17a   : > { %1685 = vsyncadd (%p1301_p1), %s912_s16, 4294967040  ;;  %s2174_s20 = sadd.s32 4294967294, %s2173_s27  }
 0x17b   : > { %s921_s14 = sand.u32 1, %s2174_s20  }
 0x17c   : > { %s922_s17 = scalar_lea.sflag [#allocation15], %s921_s14 }
 0x17d   : > { %1687 = dma.done.wait (%p1301_p1), %s922_s17, 512  }
 0x17e   : > { %1689 = vsyncadd (%p1301_p1), %s922_s17, 4294966784  ;;  %s36_s22 = sadd.s32 1, %s2173_s27   ;;  %s2175_s30 = sld [smem:[#allocation29_spill]] }
 0x17f   : > { %p33_p4 = scmp.ge.s32.totalorder %s36_s22, 4   ;;  %s2176_s20 = sld [smem:[#allocation25_spill]] }
 0x180   : > { %s2177_s21 = sld [smem:[#allocation27_spill]]  ;;  %s2178_s17 = smov %s1696_s18 }
 0x181   : > { %s2179_s18 = smov %s1700_s19  ;;  %35 = sbr.rel (!%p33_p4) target bundleno = 20 (0x14), region = 190 }
 0x184   : > { %s2180_s19 = smov %s2175_s30 }
 0x186   :  { %938 = vsyncpa [#allocation3], 1 }
 0x187   :  { %940 = vsyncpa [#allocation3 + $0x1], 1 }
 0x188   :  { %941 = vsyncpa [#allocation6], 1 }
 0x189   :  { %943 = vsyncpa [#allocation6 + $0x1], 1 }
 0x18a   :  { %944 = vsyncpa [#allocation9], 1 }
 0x18b   :  { %945 = vsyncpa [#allocation12], 1 }
 0x18c   :  { %946 = vsyncpa [#allocation4], 1 }
 0x18d   :  { %948 = vsyncpa [#allocation4 + $0x1], 1 }
 0x18e   :  { %949 = vsyncpa [#allocation15], 1 }
 0x18f   :  { %951 = vsyncpa [#allocation15 + $0x1], 1 }

</bundles_post_ra>
